<compile_context>
chip_gen: v5e
topology: v5e:2x2
jax: 0.10.0
libtpu: 0.0.40
codegen_flags: <defaults>
</compile_context>

<pallas_src>
import jax
import jax.numpy as jnp
from jax import lax
from jax.experimental import pallas as pl
from jax.experimental.pallas import tpu as pltpu


def _round_up(n, m):
    return ((n + m - 1) // m) * m


def _mlp_kernel(x_ref, w1_ref, b1_ref, w2_ref, b2_ref, w3t_ref, b3_ref, ot_ref):
    """One batch tile of the fused MLP.

    x_ref   : (TB, D)   float32 tile straight from HBM (no wrapper transpose/cast/pad)
    w1_ref  : (H1, D)   compute dtype, PyTorch (out, in) layout
    w2_ref  : (H2, H1)  compute dtype
    w3t_ref : (H2, O)   float32 column (fc3 weight transposed, used on the VPU)
    b*_ref  : (out, 1)  float32 columns (broadcast along the lane/batch axis)
    ot_ref  : (O, TB)   float32, lane-dense output slab
    """
    cd = w1_ref.dtype

    # fc1 + ReLU: contract the feature dim of (H1, D) against (TB, D) -> (H1, TB).
    # rhs-transposed matmul is handled by the MXU; batch lands on the lane axis.
    h1 = lax.dot_general(
        w1_ref[...], x_ref[...].astype(cd),
        (((1,), (1,)), ((), ())),
        preferred_element_type=jnp.float32)
    h1 = jnp.maximum(h1 + b1_ref[...], 0.0)

    # fc2 + ReLU: (H2, H1) @ (H1, TB) -> (H2, TB), f32 accumulation.
    h2 = lax.dot_general(
        w2_ref[...], h1.astype(cd),
        (((1,), (0,)), ((), ())),
        preferred_element_type=jnp.float32)
    h2 = jnp.maximum(h2 + b2_ref[...], 0.0)

    # fc3 + Sigmoid on the VPU/XLU: an M=1 MXU pass would be ~0.4% utilized and force a
    # (H2, TB) cast; broadcast-multiply + cross-sublane reduce uses the idle XLU slot.
    z = jnp.sum(w3t_ref[...] * h2, axis=0, keepdims=True) + b3_ref[...]
    ot_ref[...] = jax.nn.sigmoid(z)


def _choose_tile(batch, tb):
    """Lane tile for the batch axis: multiple of 128, large enough to amortize the
    per-grid-step overhead, no larger than the (rounded-up) batch, and split >= 2 ways
    when possible so the megacore-parallel axis feeds both v7x TensorCores."""
    tb = _round_up(max(int(tb), 128), 128)
    tb = min(tb, _round_up(batch, 128))
    if batch > 128 and pl.cdiv(batch, tb) < 2:
        tb = max(128, _round_up(pl.cdiv(batch, 2), 128))
    return tb


def simple_nn_forward(x, params, *, tb=4096, compute_dtype=jnp.float32):
    """Fused SimpleNN forward. x: (B, D) float32. Returns (B, 1) float32 probabilities.

    params: (w1, b1, w2, b2, w3, b3); weights in PyTorch (out, in) layout, biases as
    (out, 1) float32 columns.
    """
    w1, b1, w2, b2, w3, b3 = params
    B, D = x.shape
    H1, H2, O = w1.shape[0], w2.shape[0], w3.shape[0]

    TB = _choose_tile(B, tb)
    grid = (pl.cdiv(B, TB),)

    # Only the tiny weights get cast in the wrapper; x streams as-is from HBM.
    w1c = w1.astype(compute_dtype)
    w2c = w2.astype(compute_dtype)
    w3t = w3.astype(jnp.float32).T            # (H2, O) column for the VPU layer 3

    flops = 2 * B * (D * H1 + H1 * H2 + H2 * O)
    bytes_accessed = (
        x.size * x.dtype.itemsize
        + w1c.size * w1c.dtype.itemsize + w2c.size * w2c.dtype.itemsize
        + w3t.size * 4 + (b1.size + b2.size + b3.size) * 4
        + B * O * 4)
    cost = pl.CostEstimate(flops=int(flops), transcendentals=int(B * O),
                           bytes_accessed=int(bytes_accessed))

    out_t = pl.pallas_call(
        _mlp_kernel,
        out_shape=jax.ShapeDtypeStruct((O, B), jnp.float32),
        grid=grid,
        in_specs=[
            # x tile marches along the batch axis -> double-buffered streaming DMA.
            pl.BlockSpec((TB, D), lambda i: (i, 0)),
            # Weights / biases: constant index_map -> fetched once, resident in VMEM.
            pl.BlockSpec((H1, D), lambda i: (0, 0)),
            pl.BlockSpec((H1, 1), lambda i: (0, 0)),
            pl.BlockSpec((H2, H1), lambda i: (0, 0)),
            pl.BlockSpec((H2, 1), lambda i: (0, 0)),
            pl.BlockSpec((H2, O), lambda i: (0, 0)),
            pl.BlockSpec((O, 1), lambda i: (0, 0)),
        ],
        # Lane-dense (1, TB) output; Pallas masks the partial last block's OOB lanes.
        out_specs=pl.BlockSpec((O, TB), lambda i: (0, i)),
        compiler_params=pltpu.CompilerParams(
            dimension_semantics=("parallel",),   # batch tiles shard across TCs on v7x
        ),
        cost_estimate=cost,
    )(x, w1c, b1, w2c, b2, w3t, b3)

    return out_t.T                               # (B, 1), matches PyTorch layout


def init_params(key, in_features):
    """PyTorch-style uniform(+/- 1/sqrt(fan_in)) init; weights (out, in), biases (out, 1)."""
    dims = [(in_features, 64), (64, 32), (32, 1)]
    params = []
    for fan_in, fan_out in dims:
        key, kw_, kb = jax.random.split(key, 3)
        bound = 1.0 / jnp.sqrt(jnp.float32(fan_in))
        w = jax.random.uniform(kw_, (fan_out, fan_in), jnp.float32, -bound, bound)
        b = jax.random.uniform(kb, (fan_out, 1), jnp.float32, -bound, bound)
        params.extend([w, b])
    return tuple(params)


def reference_forward(x, params):
    """Plain-JAX float32 reference matching the PyTorch forward."""
    w1, b1, w2, b2, w3, b3 = params
    h1 = jnp.maximum(x @ w1.T + b1.T, 0.0)
    h2 = jnp.maximum(h1 @ w2.T + b2.T, 0.0)
    return jax.nn.sigmoid(h2 @ w3.T + b3.T)


if __name__ == "__main__":
    key = jax.random.PRNGKey(0)
    key, kx = jax.random.split(key)

    # 16 input features (X_train.shape[1]); a ragged batch exercises partial-block
    # masking and a 2-step, megacore-parallel grid (TB auto-clamps to 256 here).
    B, D = 300, 16
    x = jax.random.normal(kx, (B, D), jnp.float32)   # StandardScaler-like inputs
    params = init_params(key, D)

    out = jax.block_until_ready(simple_nn_forward(x, params))
    ref = reference_forward(x, params)

    assert out.shape == (B, 1)
    assert bool(jnp.all(jnp.isfinite(out)))
    # 3e-3 abs tolerance covers differing MXU f32 pass-count defaults (Mosaic vs XLA).
    assert jnp.allclose(out, ref, atol=3e-3, rtol=1e-3), float(jnp.max(jnp.abs(out - ref)))

    print("KERNEL_OK")
</pallas_src>

<mosaic_0001>
module attributes {stable_mosaic.version = 11 : i64} {
  func.func @_mlp_kernel(%arg0: i32, %arg1: memref<256x16xf32, #tpu.memory_space<vmem>>, %arg2: memref<64x16xf32, #tpu.memory_space<vmem>>, %arg3: memref<64x1xf32, #tpu.memory_space<vmem>>, %arg4: memref<32x64xf32, #tpu.memory_space<vmem>>, %arg5: memref<32x1xf32, #tpu.memory_space<vmem>>, %arg6: memref<32x1xf32, #tpu.memory_space<vmem>>, %arg7: memref<1x1xf32, #tpu.memory_space<vmem>>, %arg8: memref<1x256xf32, #tpu.memory_space<vmem>>) attributes {dimension_semantics = [#tpu.dimension_semantics<parallel>], iteration_bounds = array<i64: 2>, scalar_prefetch = 0 : i64, scratch_operands = 0 : i64, tpu.core_type = #tpu.core_type<tc>, window_params = [{transform_indices = @transform_0, window_bounds = array<i64: 256, 16>}, {pipeline_mode = #tpu.pipeline_mode<synchronous>, transform_indices = @transform_1, window_bounds = array<i64: 64, 16>}, {pipeline_mode = #tpu.pipeline_mode<synchronous>, transform_indices = @transform_2, window_bounds = array<i64: 64, 1>}, {pipeline_mode = #tpu.pipeline_mode<synchronous>, transform_indices = @transform_3, window_bounds = array<i64: 32, 64>}, {pipeline_mode = #tpu.pipeline_mode<synchronous>, transform_indices = @transform_4, window_bounds = array<i64: 32, 1>}, {pipeline_mode = #tpu.pipeline_mode<synchronous>, transform_indices = @transform_5, window_bounds = array<i64: 32, 1>}, {pipeline_mode = #tpu.pipeline_mode<synchronous>, transform_indices = @transform_6, window_bounds = array<i64: 1, 1>}, {transform_indices = @transform_7, window_bounds = array<i64: 1, 256>}]} {
    %c0 = arith.constant 0 : index
    %c0_0 = arith.constant 0 : index
    %0 = vector.load %arg2[%c0, %c0_0] : memref<64x16xf32, #tpu.memory_space<vmem>>, vector<64x16xf32>
    %c0_1 = arith.constant 0 : index
    %c0_2 = arith.constant 0 : index
    %1 = vector.load %arg1[%c0_1, %c0_2] : memref<256x16xf32, #tpu.memory_space<vmem>>, vector<256x16xf32>
    %cst = arith.constant dense<0.000000e+00> : vector<64x256xf32>
    %2 = tpu.matmul %0, %1, %cst {dimension_numbers = #tpu.dot_dimension_numbers<[1], [1], [0], [0], [0, 0, 1, 0], [], []>} : vector<64x16xf32>, vector<256x16xf32>, vector<64x256xf32> -> vector<64x256xf32>
    %c0_3 = arith.constant 0 : index
    %c0_4 = arith.constant 0 : index
    %3 = vector.load %arg3[%c0_3, %c0_4] : memref<64x1xf32, #tpu.memory_space<vmem>>, vector<64x1xf32>
    %4 = vector.broadcast %3 : vector<64x1xf32> to vector<64x256xf32>
    %5 = arith.addf %2, %4 : vector<64x256xf32>
    %cst_5 = arith.constant 0.000000e+00 : f32
    %6 = vector.broadcast %cst_5 : f32 to vector<64x256xf32>
    %7 = arith.maximumf %5, %6 : vector<64x256xf32>
    %c0_6 = arith.constant 0 : index
    %c0_7 = arith.constant 0 : index
    %8 = vector.load %arg4[%c0_6, %c0_7] : memref<32x64xf32, #tpu.memory_space<vmem>>, vector<32x64xf32>
    %cst_8 = arith.constant dense<0.000000e+00> : vector<32x256xf32>
    %9 = tpu.matmul %8, %7, %cst_8 {dimension_numbers = #tpu.dot_dimension_numbers<[1], [0], [0], [1], [0, 0, 1, 1], [], []>} : vector<32x64xf32>, vector<64x256xf32>, vector<32x256xf32> -> vector<32x256xf32>
    %c0_9 = arith.constant 0 : index
    %c0_10 = arith.constant 0 : index
    %10 = vector.load %arg5[%c0_9, %c0_10] : memref<32x1xf32, #tpu.memory_space<vmem>>, vector<32x1xf32>
    %11 = vector.broadcast %10 : vector<32x1xf32> to vector<32x256xf32>
    %12 = arith.addf %9, %11 : vector<32x256xf32>
    %cst_11 = arith.constant 0.000000e+00 : f32
    %13 = vector.broadcast %cst_11 : f32 to vector<32x256xf32>
    %14 = arith.maximumf %12, %13 : vector<32x256xf32>
    %c0_12 = arith.constant 0 : index
    %c0_13 = arith.constant 0 : index
    %15 = vector.load %arg6[%c0_12, %c0_13] : memref<32x1xf32, #tpu.memory_space<vmem>>, vector<32x1xf32>
    %16 = vector.broadcast %15 : vector<32x1xf32> to vector<32x256xf32>
    %17 = arith.mulf %16, %14 : vector<32x256xf32>
    %cst_14 = arith.constant dense<0.000000e+00> : vector<256xf32>
    %18 = vector.multi_reduction <add>, %17, %cst_14 [0] : vector<32x256xf32> to vector<256xf32>
    %19 = vector.shape_cast %18 : vector<256xf32> to vector<1x256xf32>
    %c0_15 = arith.constant 0 : index
    %c0_16 = arith.constant 0 : index
    %20 = vector.load %arg7[%c0_15, %c0_16] : memref<1x1xf32, #tpu.memory_space<vmem>>, vector<1x1xf32>
    %21 = vector.broadcast %20 : vector<1x1xf32> to vector<1x256xf32>
    %22 = arith.addf %19, %21 : vector<1x256xf32>
    %23 = arith.negf %22 : vector<1x256xf32>
    %24 = math.exp %23 : vector<1x256xf32>
    %cst_17 = arith.constant 1.000000e+00 : f32
    %25 = vector.broadcast %cst_17 : f32 to vector<1x256xf32>
    %26 = arith.addf %25, %24 : vector<1x256xf32>
    %27 = arith.divf %25, %26 : vector<1x256xf32>
    %c0_18 = arith.constant 0 : index
    %c0_19 = arith.constant 0 : index
    %28 = vector.load %arg8[%c0_18, %c0_19] : memref<1x256xf32, #tpu.memory_space<vmem>>, vector<1x256xf32>
    tpu.vector_store %arg8[%c0_18, %c0_19], %27 {strides = array<i32>} : memref<1x256xf32, #tpu.memory_space<vmem>>, vector<1x256xf32>,
    return
  }
  func.func @transform_0(%arg0: i32) -> (i32, i32) {
    %c0_i32 = arith.constant 0 : i32
    %c0_i32_0 = arith.constant 0 : i32
    return %arg0, %c0_i32 : i32, i32
  }
  func.func @transform_1(%arg0: i32) -> (i32, i32) {
    %c0_i32 = arith.constant 0 : i32
    %c0_i32_0 = arith.constant 0 : i32
    %c0_i32_1 = arith.constant 0 : i32
    return %c0_i32, %c0_i32_0 : i32, i32
  }
  func.func @transform_2(%arg0: i32) -> (i32, i32) {
    %c0_i32 = arith.constant 0 : i32
    %c0_i32_0 = arith.constant 0 : i32
    %c0_i32_1 = arith.constant 0 : i32
    return %c0_i32, %c0_i32_0 : i32, i32
  }
  func.func @transform_3(%arg0: i32) -> (i32, i32) {
    %c0_i32 = arith.constant 0 : i32
    %c0_i32_0 = arith.constant 0 : i32
    %c0_i32_1 = arith.constant 0 : i32
    return %c0_i32, %c0_i32_0 : i32, i32
  }
  func.func @transform_4(%arg0: i32) -> (i32, i32) {
    %c0_i32 = arith.constant 0 : i32
    %c0_i32_0 = arith.constant 0 : i32
    %c0_i32_1 = arith.constant 0 : i32
    return %c0_i32, %c0_i32_0 : i32, i32
  }
  func.func @transform_5(%arg0: i32) -> (i32, i32) {
    %c0_i32 = arith.constant 0 : i32
    %c0_i32_0 = arith.constant 0 : i32
    %c0_i32_1 = arith.constant 0 : i32
    return %c0_i32, %c0_i32_0 : i32, i32
  }
  func.func @transform_6(%arg0: i32) -> (i32, i32) {
    %c0_i32 = arith.constant 0 : i32
    %c0_i32_0 = arith.constant 0 : i32
    %c0_i32_1 = arith.constant 0 : i32
    return %c0_i32, %c0_i32_0 : i32, i32
  }
  func.func @transform_7(%arg0: i32) -> (i32, i32) {
    %c0_i32 = arith.constant 0 : i32
    %c0_i32_0 = arith.constant 0 : i32
    return %c0_i32, %arg0 : i32, i32
  }
}

</mosaic_0001>

<bundles_post_ra>
// kernel: tpu_custom_call.1
= control target key start
LH: loop header
LB: loop body
LE: loop exit
PB: predicated region body
PF: predicated region fallthrough
CT: control target
= control target key end

     0   :  { %s1495_s0 = inlined_call_operand.vmem [shape: f32[300,16], index: 0, kind: input, shape index: {}]   ;;  %s1496_s1 = inlined_call_operand.vmem [shape: f32[64,16], index: 1, kind: input, shape index: {}]   ;;  %s1497_s2 = inlined_call_operand.vmem [shape: f32[64,1], index: 2, kind: input, shape index: {}]   ;;  %s1498_s3 = inlined_call_operand.vmem [shape: f32[32,64], index: 3, kind: input, shape index: {}]   ;;  %s1499_s4 = inlined_call_operand.vmem [shape: f32[32,1], index: 4, kind: input, shape index: {}]   ;;  %s1500_s5 = inlined_call_operand.vmem [shape: f32[32,1], index: 5, kind: input, shape index: {}]   ;;  %s1501_s6 = inlined_call_operand.<no memory space> [shape: f32[1,1], index: 6, kind: input, shape index: {}]   ;;  %s1502_s7 = inlined_call_operand.hbm [shape: f32[1,300], index: 7, kind: output, shape index: {}]  }
   0x1   :  { %v12_v0 = vstv %s1501_s6 }
   0x2   :  { %13 = vst [vmem:[#allocation2] sm:$0x1] %v12_v0 }
   0x3   :  { %14 = vsyncpa [#allocation4], 0 }
   0x4   :  { %16 = vsyncpa [#allocation4 + $0x1], 0  ;;  %s1179_s26 = smov 0   ;;  %s1181_s27 = smov 0  }
   0x5   :  { %s1183_s28 = smov 0   ;;  %s1185_s29 = smov 0  }
   0x6 LB: > { %s1200_s6 = sadd.s32 4294967295, %s1132_s29   ;;  %s907_s30 = sadd.s32 4294967294, %s1132_s29   ;;  %s1132_s29 = sphi %s1185_s29, %s1510_s29   ;;  %s1128_s28 = sphi %s1183_s28, %s1509_s28   ;;  %s1124_s27 = sphi %s1181_s27, %s1508_s27   ;;  %s1120_s26 = sphi %s1179_s26, %s1507_s26  }
   0x7   : > { %s1204_s8 = sadd.s32 1, %s1132_s29   ;;  %s181_s9 = sadd.s32 1, %s1128_s28 }
   0x8   : > { %s178_s10 = ssub.s32 %s1132_s29, %s1204_s8  ;;  %p191_p0 = scmp.ne.s32.totalorder %s1128_s28, %s1124_s27 }
   0x9   : > { %p179_p1 = scmp.eq.s32.totalorder %s178_s10, 0  ;;  %p192_p2 = scmp.eq.s32.totalorder %s1200_s6, 1 }
   0xa   : > { %p197_p3 = scmp.ne.s32.totalorder %s1124_s27, %s1120_s26  ;;  %p198_p4 = scmp.eq.s32.totalorder %s907_s30, 1 }
   0xb   : > { %s1215_s11 = scalar_select %p179_p1, %s1128_s28, %s181_s9  }
   0xc   : > { %p1217_p5 = por %p192_p2, %p191_p0  ;;  %p1221_p6 = por %p198_p4, %p197_p3 }
   0xd   : > { %p910_p7 = scmp.ge.s32.totalorder %s1132_s29, 1  ;;  %p251_p8 = scmp.lt.s32.totalorder %s1132_s29, 3 }
   0xf   : > { %p252_p9 = pnand %p910_p7, %p251_p8 }
  0x10   : > { %s912_s14 = sshll.u32 (!%p252_p9), %s1200_s6, 5 }
  0x11   : > { %255 = sbr.rel (%p252_p9) target bundleno = 510 (0x1fe), region = 48  ;;  %p292_p10 = scmp.lt.s32.totalorder (!%p252_p9), %s912_s14, 37 }
  0x16   : > { %s1512_s14 = smov (!%p292_p10, %s912_s14), 37  ;;  %vm393_vm0 = vcmask 130048   ;;  %v350_v15 = vld [vmem:[%s1497_s2 + $0x28] sm:$0xff]  ;;  %v1134_v18 = vmov 0   ;;  %v352_v21 = vld [vmem:[%s1497_s2 + $0x38] sm:$0xff]  ;;  %v349_v22 = vld [vmem:[%s1497_s2 + $0x20] sm:$0xff] }
  0x17   : > { %s913_s15 = sshll.u32 %s1512_s14, 3  ;;  %1049 = vset.pattern.permute.xlu1 %v1134_v18  ;;  %1048 = vset.pattern.permute.xlu0 %v1134_v18  ;;  %v351_v27 = vld [vmem:[%s1497_s2 + $0x30] sm:$0xff]  ;;  %v345_v28 = vld [vmem:[%s1497_s2] sm:$0xff]  ;;  %v346_v33 = vld [vmem:[%s1497_s2 + $0x8] sm:$0xff]  ;;  %vm640_vm1 = vcmask 523264   ;;  %vm819_vm9 = vcmask 1040384  }
  0x18   : > { %s1231_s18 = scalar_lea.vmem %s1495_s0, %s913_s15  ;;  %380 = vperm.xlu1 %1049, %v350_v15   ;;  %1050 = vset.pattern.permute.xlu2 %v1134_v18  ;;  %v617_v38 = vld [vmem:[%s1499_s4 + $0x8] sm:$0xff]  ;;  %v618_v39 = vld [vmem:[%s1499_s4 + $0x10] sm:$0xff]  ;;  %v305_v42 = vld [vmem:[%s1496_s1] sm:$0xff]  ;;  %s284_s15 = sand.u32 1, %s1124_s27  }
  0x19   : > { %v328_v1 = vld [vmem:[%s1231_s18 + $0x78] sm:$0xff]  ;;  %v327_v3 = vld [vmem:[%s1231_s18 + $0x70] sm:$0xff]  ;;  %v326_v5 = vld [vmem:[%s1231_s18 + $0x68] sm:$0xff]  ;;  %390 = vperm.xlu0 %1048, %v352_v21   ;;  %s911_s16 = sshll.u32 %s284_s15, 1  ;;  %s1440_s19 = scalar_lea.sflag [#allocation4], %s284_s15 }
  0x1a   : > { %v344_v2 = vld [vmem:[%s1231_s18 + $0xf8] sm:$0xff]  ;;  %914 = vmatpush.xpose.msk.msra.mxu0 %vm393_vm0, %v328_v1  ;;  %v343_v4 = vld [vmem:[%s1231_s18 + $0xf0] sm:$0xff]  ;;  %977 = vmatpush.xpose.msk.msra.mxu2 %vm393_vm0, %v328_v1  ;;  %v342_v6 = vld [vmem:[%s1231_s18 + $0xe8] sm:$0xff]  ;;  %s286_s17 = scalar_lea.vmem [#allocation3], %s911_s16  ;;  %s973_s20 = sshll.u32 (%p1217_p5), %s1200_s6, 1 }
  0x1b   : > { %938 = vmatpush.xpose.msk.msra.mxu1 %vm393_vm0, %v344_v2  ;;  %993 = vmatpush.xpose.msk.msra.mxu3 %vm393_vm0, %v344_v2  ;;  %v325_v7 = vld [vmem:[%s1231_s18 + $0x60] sm:$0xff]  ;;  %v324_v9 = vld [vmem:[%s1231_s18 + $0x58] sm:$0xff]  ;;  %v323_v11 = vld [vmem:[%s1231_s18 + $0x50] sm:$0xff]  ;;  %s836_s21 = ssub.s32 (%p1217_p5), 3, %s973_s20 }
  0x1c   : > { %v341_v8 = vld [vmem:[%s1231_s18 + $0xe0] sm:$0xff]  ;;  %v340_v10 = vld [vmem:[%s1231_s18 + $0xd8] sm:$0xff]  ;;  %v339_v12 = vld [vmem:[%s1231_s18 + $0xd0] sm:$0xff]  ;;  %p837_p11 = scmp.lt.s32.totalorder (%p1217_p5), %s836_s21, 2 }
  0x1d   : > { %v322_v13 = vld [vmem:[%s1231_s18 + $0x48] sm:$0xff]  ;;  %v321_v16 = vld [vmem:[%s1231_s18 + $0x40] sm:$0xff]  ;;  %v320_v19 = vld [vmem:[%s1231_s18 + $0x38] sm:$0xff] }
  0x1e   : > { %915 = vmatpush.xpose.msk.msra.mxu0 %vm393_vm0, %v327_v3  ;;  %978 = vmatpush.xpose.msk.msra.mxu2 %vm393_vm0, %v327_v3  ;;  %v338_v14 = vld [vmem:[%s1231_s18 + $0xc8] sm:$0xff]  ;;  %v337_v17 = vld [vmem:[%s1231_s18 + $0xc0] sm:$0xff]  ;;  %v336_v20 = vld [vmem:[%s1231_s18 + $0xb8] sm:$0xff] }
  0x1f   : > { %939 = vmatpush.xpose.msk.msra.mxu1 %vm393_vm0, %v343_v4  ;;  %994 = vmatpush.xpose.msk.msra.mxu3 %vm393_vm0, %v343_v4  ;;  %v319_v23 = vld [vmem:[%s1231_s18 + $0x30] sm:$0xff]  ;;  %v318_v25 = vld [vmem:[%s1231_s18 + $0x28] sm:$0xff]  ;;  %v317_v29 = vld [vmem:[%s1231_s18 + $0x20] sm:$0xff] }
  0x20   : > { %v335_v24 = vld [vmem:[%s1231_s18 + $0xb0] sm:$0xff]  ;;  %375 = vperm.xlu1 %1049, %v349_v22   ;;  %v334_v26 = vld [vmem:[%s1231_s18 + $0xa8] sm:$0xff]  ;;  %v333_v30 = vld [vmem:[%s1231_s18 + $0xa0] sm:$0xff] }
  0x21   : > { %385 = vperm.xlu0 %1048, %v351_v27   ;;  %v316_v31 = vld [vmem:[%s1231_s18 + $0x18] sm:$0xff]  ;;  %v315_v34 = vld [vmem:[%s1231_s18 + $0x10] sm:$0xff]  ;;  %v314_v36 = vld [vmem:[%s1231_s18 + $0x8] sm:$0xff] }
  0x22   : > { %916 = vmatpush.xpose.msk.msra.mxu0 %vm393_vm0, %v326_v5  ;;  %979 = vmatpush.xpose.msk.msra.mxu2 %vm393_vm0, %v326_v5  ;;  %v332_v32 = vld [vmem:[%s1231_s18 + $0x98] sm:$0xff]  ;;  %v331_v35 = vld [vmem:[%s1231_s18 + $0x90] sm:$0xff]  ;;  %v330_v37 = vld [vmem:[%s1231_s18 + $0x88] sm:$0xff] }
  0x23   : > { %940 = vmatpush.xpose.msk.msra.mxu1 %vm393_vm0, %v342_v6  ;;  %995 = vmatpush.xpose.msk.msra.mxu3 %vm393_vm0, %v342_v6  ;;  %v313_v40 = vld [vmem:[%s1231_s18] sm:$0xff]  ;;  %v311_v43 = vld [vmem:[%s1496_s1 + $0x30] sm:$0xff]  ;;  %v720_v45 = vld [vmem:[%s1500_s5 + $0x8] sm:$0xff] }
  0x24   : > { %v329_v41 = vld [vmem:[%s1231_s18 + $0x80] sm:$0xff]  ;;  %v306_v46 = vld [vmem:[%s1496_s1 + $0x8] sm:$0xff]  ;;  %v312_v47 = vld [vmem:[%s1496_s1 + $0x38] sm:$0xff] }
  0x25   : > { %v719_v44 = vld [vmem:[%s1500_s5] sm:$0xff]  ;;  %v348_v48 = vld [vmem:[%s1497_s2 + $0x18] sm:$0xff]  ;;  %v307_v51 = vld [vmem:[%s1496_s1 + $0x10] sm:$0xff] }
  0x26   : > { %917 = vmatpush.xpose.msk.msra.mxu0 %vm393_vm0, %v325_v7  ;;  %980 = vmatpush.xpose.msk.msra.mxu2 %vm393_vm0, %v325_v7  ;;  %v722_v49 = vld [vmem:[%s1500_s5 + $0x18] sm:$0xff]  ;;  %v769_v50 = vld [vmem:[#allocation2] sm:$0x1]  ;;  %v347_v52 = vld [vmem:[%s1497_s2 + $0x10] sm:$0xff] }
  0x27   : > { %941 = vmatpush.xpose.msk.msra.mxu1 %vm393_vm0, %v341_v8  ;;  %996 = vmatpush.xpose.msk.msra.mxu3 %vm393_vm0, %v341_v8  ;;  %v308_v53 = vld [vmem:[%s1496_s1 + $0x18] sm:$0xff]  ;;  %v616_v54 = vld [vmem:[%s1499_s4] sm:$0xff]  ;;  %v310_v57 = vld [vmem:[%s1496_s1 + $0x28] sm:$0xff] }
  0x28   : > { %355 = vperm.xlu1 %1049, %v345_v28   ;;  %370 = vperm.xlu2 %1050, %v348_v48   ;;  %v309_v55 = vld [vmem:[%s1496_s1 + $0x20] sm:$0xff]  ;;  %v619_v56 = vld [vmem:[%s1499_s4 + $0x18] sm:$0xff]  ;;  %v721_v58 = vld [vmem:[%s1500_s5 + $0x10] sm:$0xff] }
  0x29   : > { %360 = vperm.xlu0 %1048, %v346_v33  }
  0x2a   : > { %918 = vmatpush.xpose.msk.msra.mxu0 %vm393_vm0, %v324_v9  ;;  %981 = vmatpush.xpose.msk.msra.mxu2 %vm393_vm0, %v324_v9 }
  0x2b   : > { %942 = vmatpush.xpose.msk.msra.mxu1 %vm393_vm0, %v340_v10  ;;  %997 = vmatpush.xpose.msk.msra.mxu3 %vm393_vm0, %v340_v10 }
  0x2e   : > { %919 = vmatpush.xpose.msk.msra.mxu0 %vm393_vm0, %v323_v11  ;;  %982 = vmatpush.xpose.msk.msra.mxu2 %vm393_vm0, %v323_v11 }
  0x2f   : > { %943 = vmatpush.xpose.msk.msra.mxu1 %vm393_vm0, %v339_v12  ;;  %998 = vmatpush.xpose.msk.msra.mxu3 %vm393_vm0, %v339_v12 }
  0x30   : > { %632 = vperm.xlu1 %1049, %v618_v39   ;;  %365 = vperm.xlu2 %1050, %v347_v52   ;;  %v613_v52 = vld [vmem:[%s1498_s3 + $0x8] sm:$0xff] }
  0x31   : > { %627 = vperm.xlu0 %1048, %v617_v38  }
  0x32   : > { %920 = vmatpush.xpose.msk.msra.mxu0 %vm393_vm0, %v322_v13  ;;  %983 = vmatpush.xpose.msk.msra.mxu2 %vm393_vm0, %v322_v13 }
  0x33   : > { %944 = vmatpush.xpose.msk.msra.mxu1 %vm393_vm0, %v338_v14  ;;  %999 = vmatpush.xpose.msk.msra.mxu3 %vm393_vm0, %v338_v14 }
  0x36   : > { %921 = vmatpush.xpose.msk.msra.mxu0 %vm393_vm0, %v321_v16  ;;  %984 = vmatpush.xpose.msk.msra.mxu2 %vm393_vm0, %v321_v16 }
  0x37   : > { %945 = vmatpush.xpose.msk.msra.mxu1 %vm393_vm0, %v337_v17  ;;  %1000 = vmatpush.xpose.msk.msra.mxu3 %vm393_vm0, %v337_v17 }
  0x38   : > { %730 = vperm.xlu1 %1049, %v720_v45   ;;  %622 = vperm.xlu2 %1050, %v616_v54   ;;  %v615_v54 = vld [vmem:[%s1498_s3 + $0x18] sm:$0xff] }
  0x39   : > { %725 = vperm.xlu0 %1048, %v719_v44  }
  0x3a   : > { %922 = vmatpush.xpose.msk.msra.mxu0 %vm393_vm0, %v320_v19  ;;  %985 = vmatpush.xpose.msk.msra.mxu2 %vm393_vm0, %v320_v19 }
  0x3b   : > { %946 = vmatpush.xpose.msk.msra.mxu1 %vm393_vm0, %v336_v20  ;;  %1001 = vmatpush.xpose.msk.msra.mxu3 %vm393_vm0, %v336_v20 }
  0x3e   : > { %923 = vmatpush.xpose.msk.msra.mxu0 %vm393_vm0, %v319_v23  ;;  %986 = vmatpush.xpose.msk.msra.mxu2 %vm393_vm0, %v319_v23 }
  0x3f   : > { %947 = vmatpush.xpose.msk.msra.mxu1 %vm393_vm0, %v335_v24  ;;  %1002 = vmatpush.xpose.msk.msra.mxu3 %vm393_vm0, %v335_v24 }
  0x40   : > { %772 = vperm.xlu1 %1049, %v769_v50   ;;  %637 = vperm.xlu2 %1050, %v619_v56  }
  0x41   : > { %740 = vperm.xlu0 %1048, %v722_v49  }
  0x42   : > { %924 = vmatpush.xpose.msk.msra.mxu0 %vm393_vm0, %v318_v25  ;;  %987 = vmatpush.xpose.msk.msra.mxu2 %vm393_vm0, %v318_v25 }
  0x43   : > { %948 = vmatpush.xpose.msk.msra.mxu1 %vm393_vm0, %v334_v26  ;;  %1003 = vmatpush.xpose.msk.msra.mxu3 %vm393_vm0, %v334_v26 }
  0x46   : > { %925 = vmatpush.xpose.msk.msra.mxu0 %vm393_vm0, %v317_v29  ;;  %988 = vmatpush.xpose.msk.msra.mxu2 %vm393_vm0, %v317_v29 }
  0x47   : > { %949 = vmatpush.xpose.msk.msra.mxu1 %vm393_vm0, %v333_v30  ;;  %1004 = vmatpush.xpose.msk.msra.mxu3 %vm393_vm0, %v333_v30 }
  0x48   : > { %735 = vperm.xlu2 %1050, %v721_v58  }
  0x4a   : > { %926 = vmatpush.xpose.msk.msra.mxu0 %vm393_vm0, %v316_v31  ;;  %989 = vmatpush.xpose.msk.msra.mxu2 %vm393_vm0, %v316_v31 }
  0x4b   : > { %950 = vmatpush.xpose.msk.msra.mxu1 %vm393_vm0, %v332_v32  ;;  %1005 = vmatpush.xpose.msk.msra.mxu3 %vm393_vm0, %v332_v32 }
  0x4e   : > { %927 = vmatpush.xpose.msk.msra.mxu0 %vm393_vm0, %v315_v34  ;;  %990 = vmatpush.xpose.msk.msra.mxu2 %vm393_vm0, %v315_v34 }
  0x4f   : > { %951 = vmatpush.xpose.msk.msra.mxu1 %vm393_vm0, %v331_v35  ;;  %1006 = vmatpush.xpose.msk.msra.mxu3 %vm393_vm0, %v331_v35 }
  0x52   : > { %928 = vmatpush.xpose.msk.msra.mxu0 %vm393_vm0, %v314_v36  ;;  %991 = vmatpush.xpose.msk.msra.mxu2 %vm393_vm0, %v314_v36 }
  0x53   : > { %952 = vmatpush.xpose.msk.msra.mxu1 %vm393_vm0, %v330_v37  ;;  %1007 = vmatpush.xpose.msk.msra.mxu3 %vm393_vm0, %v330_v37 }
  0x56   : > { %929 = vmatpush.xpose.msk.msra.mxu0 %vm393_vm0, %v313_v40  ;;  %992 = vmatpush.xpose.msk.msra.mxu2 %vm393_vm0, %v313_v40 }
  0x57   : > { %953 = vmatpush.xpose.msk.msra.mxu1 %vm393_vm0, %v329_v41  ;;  %1008 = vmatpush.xpose.msk.msra.mxu3 %vm393_vm0, %v329_v41 }
  0x59   : > { %930 = vmatmul.msk.f32.vlgmr.msra.gmra.mxu0 %vm393_vm0, %v305_v42  ;;  %936 = vmatmul.msk.f32.vlgmr.msra.gmra.mxu2 %vm393_vm0, %v311_v43 }
  0x5a   : > { %954 = vmatmul.msk.f32.vlgmr.msra.gmra.mxu1 %vm393_vm0, %v305_v42  ;;  %960 = vmatmul.msk.f32.vlgmr.msra.gmra.mxu3 %vm393_vm0, %v311_v43 }
  0x61   : > { %931 = vmatmul.msk.f32.gmra.mxu0 %vm393_vm0, %v306_v46  ;;  %937 = vmatmul.msk.f32.gmra.mxu2 %vm393_vm0, %v312_v47 }
  0x62   : > { %955 = vmatmul.msk.f32.gmra.mxu1 %vm393_vm0, %v306_v46  ;;  %961 = vmatmul.msk.f32.gmra.mxu3 %vm393_vm0, %v312_v47 }
  0x69   : > { %932 = vmatmul.msk.f32.gmra.mxu0 %vm393_vm0, %v307_v51 }
  0x6a   : > { %956 = vmatmul.msk.f32.gmra.mxu1 %vm393_vm0, %v307_v51  ;;  %v612_v51 = vld [vmem:[%s1498_s3] sm:$0xff] }
  0x71   : > { %933 = vmatmul.msk.f32.gmra.mxu0 %vm393_vm0, %v308_v53 }
  0x72   : > { %957 = vmatmul.msk.f32.gmra.mxu1 %vm393_vm0, %v308_v53  ;;  %v614_v53 = vld [vmem:[%s1498_s3 + $0x10] sm:$0xff] }
  0x79   : > { %934 = vmatmul.msk.f32.gmra.mxu0 %vm393_vm0, %v309_v55 }
  0x7a   : > { %958 = vmatmul.msk.f32.gmra.mxu1 %vm393_vm0, %v309_v55 }
  0x81   : > { %935 = vmatmul.msk.f32.gmra.mxu0 %vm393_vm0, %v310_v57 }
  0x82   : > { %959 = vmatmul.msk.f32.gmra.mxu1 %vm393_vm0, %v310_v57  ;;  %v371_v20 = vpop.permute.xlu2 %370 }
  0x8a   : > { %v381_v17 = vpop.permute.xlu1 %380  ;;  %v366_v32 = vpop.permute.xlu2 %365 }
  0x8b   : > { %v391_v61 = vpop.permute.xlu0 %390 }
  0x92   : > { %v376_v21 = vpop.permute.xlu1 %375  ;;  %v623_v57 = vpop.permute.xlu2 %622 }
  0x93   : > { %v386_v2 = vpop.permute.xlu0 %385 }
  0x9a   : > { %v356_v37 = vpop.permute.xlu1 %355 }
  0x9b   : > { %v361_v38 = vpop.permute.xlu0 %360 }
  0xa3   : > { %v628_v58 = vpop.permute.xlu0 %627 }
  0xd6   : > { %v531_v59 = vpop.f32.mrf.mxu0 }
  0xd7   : > { %v572_v60 = vpop.f32.mrf.mxu1  ;;  %v532_v43 = vadd.f32 %v531_v59, %v356_v37 }
  0xd8   : > { %v573_v44 = vadd.f32 %v572_v60, %v356_v37 }
  0xd9   : > { %v596_v49 = vmax.f32 %v532_v43, 0.0 }
  0xda   : > { %v597_v50 = vmax.f32 %v573_v44, 0.0 }
  0xdc   : > { %v549_v63 = vpop.f32.mrf.mxu2 }
  0xdd   : > { %v590_v62 = vpop.f32.mrf.mxu3  ;;  %v550_v4 = vadd.f32 %v549_v63, %v386_v2 }
  0xde   : > { %v534_v0 = vpop.f32.mrf.mxu0  ;;  %v591_v3 = vadd.f32 %v590_v62, %v386_v2  ;;  %v638_v62 = vpop.permute.xlu2 %637 }
  0xdf   : > { %v575_v1 = vpop.f32.mrf.mxu1  ;;  %v608_v12 = vmax.f32 %v550_v4, 0.0  ;;  %v535_v39 = vadd.f32 %v534_v0, %v361_v38 }
  0xe0   : > { %v609_v11 = vmax.f32 %v591_v3, 0.0  ;;  %v576_v40 = vadd.f32 %v575_v1, %v361_v38 }
  0xe1   : > { %v598_v47 = vmax.f32 %v535_v39, 0.0 }
  0xe2   : > { %v599_v48 = vmax.f32 %v576_v40, 0.0 }
  0xe4   : > { %v552_v6 = vpop.f32.mrf.mxu2 }
  0xe5   : > { %v593_v5 = vpop.f32.mrf.mxu3  ;;  %v553_v10 = vadd.f32 %v552_v6, %v391_v61 }
  0xe6   : > { %v537_v7 = vpop.f32.mrf.mxu0  ;;  %v594_v9 = vadd.f32 %v593_v5, %v391_v61  ;;  %v633_v61 = vpop.permute.xlu1 %632 }
  0xe7   : > { %v578_v8 = vpop.f32.mrf.mxu1  ;;  %v610_v14 = vmax.f32 %v553_v10, 0.0  ;;  %v538_v33 = vadd.f32 %v537_v7, %v366_v32  ;;  %v726_v7 = vpop.permute.xlu0 %725 }
  0xe8   : > { %v611_v13 = vmax.f32 %v594_v9, 0.0  ;;  %v579_v34 = vadd.f32 %v578_v8, %v366_v32 }
  0xe9   : > { %661 = vmatpush.msrb.mxu2 %v610_v14  ;;  %v600_v45 = vmax.f32 %v538_v33, 0.0 }
  0xea   : > { %690 = vmatpush.msrb.mxu3 %v611_v13  ;;  %v601_v46 = vmax.f32 %v579_v34, 0.0 }
  0xeb   : > { %662 = vmatpush.msrb.mxu2 %v608_v12 }
  0xec   : > { %691 = vmatpush.msrb.mxu3 %v609_v11 }
  0xee   : > { %v540_v15 = vpop.f32.mrf.mxu0  ;;  %v731_v14 = vpop.permute.xlu1 %730 }
  0xef   : > { %v581_v16 = vpop.f32.mrf.mxu1  ;;  %v541_v28 = vadd.f32 %v540_v15, %v371_v20  ;;  %v736_v15 = vpop.permute.xlu2 %735 }
  0xf0   : > { %v582_v29 = vadd.f32 %v581_v16, %v371_v20 }
  0xf1   : > { %v602_v41 = vmax.f32 %v541_v28, 0.0 }
  0xf2   : > { %v603_v42 = vmax.f32 %v582_v29, 0.0 }
  0xf6   : > { %v543_v18 = vpop.f32.mrf.mxu0 }
  0xf7   : > { %v584_v19 = vpop.f32.mrf.mxu1  ;;  %v544_v24 = vadd.f32 %v543_v18, %v376_v21 }
  0xf8   : > { %v585_v25 = vadd.f32 %v584_v19, %v376_v21 }
  0xf9   : > { %v604_v35 = vmax.f32 %v544_v24, 0.0 }
  0xfa   : > { %v605_v36 = vmax.f32 %v585_v25, 0.0 }
  0xfe   : > { %v546_v22 = vpop.f32.mrf.mxu0 }
  0xff   : > { %v587_v23 = vpop.f32.mrf.mxu1  ;;  %v547_v26 = vadd.f32 %v546_v22, %v381_v17 }
 0x100   : > { %v588_v27 = vadd.f32 %v587_v23, %v381_v17 }
 0x101   : > { %v606_v30 = vmax.f32 %v547_v26, 0.0 }
 0x102   : > { %v607_v31 = vmax.f32 %v588_v27, 0.0 }
 0x103   : > { %663 = vmatpush.msrb.mxu2 %v606_v30  ;;  %v741_v30 = vpop.permute.xlu0 %740 }
 0x104   : > { %692 = vmatpush.msrb.mxu3 %v607_v31 }
 0x105   : > { %664 = vmatpush.msrb.mxu2 %v604_v35 }
 0x106   : > { %693 = vmatpush.msrb.mxu3 %v605_v36 }
 0x107   : > { %665 = vmatpush.msrb.mxu2 %v602_v41 }
 0x108   : > { %694 = vmatpush.msrb.mxu3 %v603_v42 }
 0x109   : > { %666 = vmatpush.msrb.mxu2 %v600_v45  ;;  %v773_v45 = vpop.permute.xlu1 %772 }
 0x10a   : > { %695 = vmatpush.msrb.mxu3 %v601_v46 }
 0x10b   : > { %667 = vmatpush.msrb.mxu2 %v598_v47 }
 0x10c   : > { %696 = vmatpush.msrb.mxu3 %v599_v48  ;;  %v775_v48 = vperm.slane %v773_v45, 0 }
 0x10d   : > { %668 = vmatpush.msrb.mxu2 %v596_v49 }
 0x10e   : > { %697 = vmatpush.msrb.mxu3 %v597_v50  ;;  %962 = vmatmul.msk.f32.vlgmr.msrb.gmra.mxu2 %vm640_vm1, %v612_v51 }
 0x10f   : > { %966 = vmatmul.msk.f32.vlgmr.msrb.gmra.mxu3 %vm640_vm1, %v612_v51 }
 0x116   : > { %963 = vmatmul.msk.f32.gmra.mxu2 %vm640_vm1, %v613_v52 }
 0x117   : > { %967 = vmatmul.msk.f32.gmra.mxu3 %vm640_vm1, %v613_v52 }
 0x11e   : > { %964 = vmatmul.msk.f32.gmra.mxu2 %vm640_vm1, %v614_v53 }
 0x11f   : > { %968 = vmatmul.msk.f32.gmra.mxu3 %vm640_vm1, %v614_v53 }
 0x126   : > { %965 = vmatmul.msk.f32.gmra.mxu2 %vm640_vm1, %v615_v54 }
 0x127   : > { %969 = vmatmul.msk.f32.gmra.mxu3 %vm640_vm1, %v615_v54 }
 0x191   : > { %v670_v55 = vpop.f32.mrf.mxu2 }
 0x192   : > { %v699_v56 = vpop.f32.mrf.mxu3  ;;  %v671_v1 = vadd.f32 %v670_v55, %v623_v57 }
 0x193   : > { %v700_v2 = vadd.f32 %v699_v56, %v623_v57 }
 0x194   : > { %v711_v10 = vmax.f32 %v671_v1, 0.0 }
 0x195   : > { %v712_v11 = vmax.f32 %v700_v2, 0.0 }
 0x196   : > { %v743_v18 = vmul.f32 %v726_v7, %v711_v10  ;;  %v822_v10 = vlaneseq }
 0x197   : > { %v744_v19 = vmul.f32 %v726_v7, %v712_v11 }
 0x198   : > { %vm824_vm11 = vcmp.lt.s32.totalorder %v822_v10, 256 }
 0x199   : > { %v673_v59 = vpop.f32.mrf.mxu2 }
 0x19a   : > { %v702_v60 = vpop.f32.mrf.mxu3  ;;  %v674_v63 = vadd.f32 %v673_v59, %v628_v58 }
 0x19b   : > { %v703_v0 = vadd.f32 %v702_v60, %v628_v58 }
 0x19c   : > { %v713_v8 = vmax.f32 %v674_v63, 0.0 }
 0x19d   : > { %v714_v9 = vmax.f32 %v703_v0, 0.0 }
 0x19e   : > { %v745_v16 = vmul.f32 %v731_v14, %v713_v8 }
 0x19f   : > { %v746_v17 = vmul.f32 %v731_v14, %v714_v9 }
 0x1a0   : > { %v751_v26 = vadd.f32 %v745_v16, %v743_v18 }
 0x1a1   : > { %v676_v3 = vpop.f32.mrf.mxu2  ;;  %v760_v27 = vadd.f32 %v746_v17, %v744_v19 }
 0x1a2   : > { %v705_v4 = vpop.f32.mrf.mxu3  ;;  %v677_v5 = vadd.f32 %v676_v3, %v633_v61 }
 0x1a3   : > { %v706_v6 = vadd.f32 %v705_v4, %v633_v61 }
 0x1a4   : > { %v715_v12 = vmax.f32 %v677_v5, 0.0 }
 0x1a5   : > { %v716_v13 = vmax.f32 %v706_v6, 0.0 }
 0x1a6   : > { %v747_v22 = vmul.f32 %v736_v15, %v715_v12 }
 0x1a7   : > { %v748_v23 = vmul.f32 %v736_v15, %v716_v13 }
 0x1a8   : > { %v752_v31 = vadd.f32 %v751_v26, %v747_v22 }
 0x1a9   : > { %v679_v20 = vpop.f32.mrf.mxu2  ;;  %v761_v32 = vadd.f32 %v760_v27, %v748_v23 }
 0x1aa   : > { %v708_v21 = vpop.f32.mrf.mxu3  ;;  %v680_v24 = vadd.f32 %v679_v20, %v638_v62 }
 0x1ab   : > { %v709_v25 = vadd.f32 %v708_v21, %v638_v62 }
 0x1ac   : > { %v717_v28 = vmax.f32 %v680_v24, 0.0 }
 0x1ad   : > { %v718_v29 = vmax.f32 %v709_v25, 0.0 }
 0x1ae   : > { %v749_v33 = vmul.f32 %v741_v30, %v717_v28 }
 0x1af   : > { %v750_v34 = vmul.f32 %v741_v30, %v718_v29 }
 0x1b0   : > { %v753_v35 = vadd.f32 %v752_v31, %v749_v33 }
 0x1b1   : > { %v762_v36 = vadd.f32 %v761_v32, %v750_v34 }
 0x1b2   : > { %v754_v37 = vrot.slane %v753_v35, 4 }
 0x1b3   : > { %v763_v38 = vrot.slane %v762_v36, 4 }
 0x1b4   : > { %v755_v39 = vadd.f32 %v754_v37, %v753_v35 }
 0x1b5   : > { %v764_v40 = vadd.f32 %v763_v38, %v762_v36 }
 0x1b6   : > { %v756_v41 = vrot.slane %v755_v39, 2 }
 0x1b7   : > { %v765_v42 = vrot.slane %v764_v40, 2 }
 0x1b8   : > { %v757_v43 = vadd.f32 %v756_v41, %v755_v39 }
 0x1b9   : > { %v766_v44 = vadd.f32 %v765_v42, %v764_v40 }
 0x1ba   : > { %v758_v46 = vrot.slane %v757_v43, 1 }
 0x1bb   : > { %v767_v47 = vrot.slane %v766_v44, 1 }
 0x1bc   : > { %v759_v49 = vadd.f32 %v758_v46, %v757_v43 }
 0x1bd   : > { %v768_v50 = vadd.f32 %v767_v47, %v766_v44 }
 0x1be   : > { %v776_v51 = vadd.f32 %v775_v48, %v759_v49 }
 0x1bf   : > { %v777_v52 = vadd.f32 %v775_v48, %v768_v50 }
 0x1c0   : > { %v970_v53 = vmul.f32 -1.442695, %v776_v51 }
 0x1c1   : > { %v971_v54 = vmul.f32 -1.442695, %v777_v52 }
 0x1c2   : > { %1051 = vpow2.f32 %v970_v53 }
 0x1c3   : > { %1053 = vpow2.f32 %v971_v54 }
 0x1c8   : > { %v1052_v55 = vpop.eup %1051 }
 0x1c9   : > { %v1054_v56 = vpop.eup %1053  ;;  %v784_v57 = vadd.f32 1.0, %v1052_v55 }
 0x1ca   : > { %v785_v58 = vadd.f32 1.0, %v1054_v56 }
 0x1cb   : > { %1055 = vrcp.f32 %v784_v57  ;;  %vm791_vm4 = vweird.f32 %v784_v57  ;;  %v797_v6 = vand.u32 2147483648, %v784_v57  ;;  %v795_v8 = vand.u32 2147483647, %v784_v57 }
 0x1cc   : > { %1057 = vrcp.f32 %v785_v58  ;;  %v812_v2 = vand.u32 2147483648, %v785_v58  ;;  %v810_v4 = vand.u32 2147483647, %v785_v58  ;;  %vm806_vm6 = vweird.f32 %v785_v58 }
 0x1cd   : > { %v798_v14 = vor.u32 1.1754944e-38, %v797_v6  ;;  %vm796_vm10 = vcmp.eq.f32.partialorder %v795_v8, 8.507059e+37 }
 0x1ce   : > { %v813_v11 = vor.u32 1.1754944e-38, %v812_v2  ;;  %vm811_vm8 = vcmp.eq.f32.partialorder %v810_v4, 8.507059e+37 }
 0x1d1   : > { %v1056_v59 = vpop.eup %1055 }
 0x1d2   : > { %v1058_v60 = vpop.eup %1057  ;;  %v787_v61 = vmul.f32 %v1056_v59, %v784_v57  ;;  %vm792_vm2 = vweird.f32 %v1056_v59 }
 0x1d3   : > { %v802_v62 = vmul.f32 %v1058_v60, %v785_v58  ;;  %vm807_vm3 = vweird.f32 %v1058_v60  ;;  %vm1430_vm5 = vmor %vm791_vm4, %vm792_vm2 }
 0x1d4   : > { %v788_v63 = vsub.f32 1.0, %v787_v61  ;;  %vm808_vm7 = vmor %vm806_vm6, %vm807_vm3 }
 0x1d5   : > { %v803_v0 = vsub.f32 1.0, %v802_v62 }
 0x1d6   : > { %v789_v1 = vmul.f32 %v1056_v59, %v788_v63 }
 0x1d7   : > { %v804_v3 = vmul.f32 %v1058_v60, %v803_v0 }
 0x1d8   : > { %v790_v5 = vadd.f32 %v1056_v59, %v789_v1 }
 0x1d9   : > { %v805_v9 = vadd.f32 %v1058_v60, %v804_v3 }
 0x1da   : > { %v794_v12 = vsel %vm1430_vm5, %v1056_v59, %v790_v5 }
 0x1db   : > { %v809_v13 = vsel %vm808_vm7, %v1058_v60, %v805_v9  ;;  %v799_v17 = vsel %vm796_vm10, %v798_v14, %v794_v12 }
 0x1dc   : > { %v814_v15 = vsel %vm811_vm8, %v813_v11, %v809_v13  ;;  %834 = sbr.rel (!%p1217_p5) target bundleno = 510 (0x1fe), region = 52 }
 0x1dd   : > { %v818_v16 = vrot.slane %v814_v15, 7 }
 0x1df   : > { %v820_v18 = vsel %vm819_vm9, %v799_v17, %v818_v16 }
 0x1e0   : > { %826 = vst.msk [vmem:[%s286_s17] sm:$0x3] %vm824_vm11, %v820_v18 }
 0x1e1   : > { %s1514_s21 = smov (!%p837_p11, %s836_s21), 2 }
 0x1e2   : > { %s839_s22 = ssub.s32 2, %s1514_s21 }
 0x1e3   : > { %s840_s23 = sshll.u32 %s839_s22, 4 }
 0x1e4   : > { %841 = vsyncadd %s1440_s19, %s840_s23  ;;  %p974_p12 = scmp.ne.s32.totalorder %s1514_s21, 0  ;;  %s843_s12 = scalar_lea.hbm %s1502_s7, %s973_s20 }
 0x1e5   : > { %s844_s25 = sshll.u32 %s1514_s21, 4  ;;  %s1454_s30 = sshll.u32 %s286_s17, 4  ;;  %s846_s30 = int_to_ptr.vmem [resolvable:$true] %s1454_s30 }
 0x1e6   : > { %s847_s6 = sshll.u32 %s843_s12, 4  ;;  %s1059_s9 = sshra.s32 %s846_s30, 4  ;;  %s848_s6 = int_to_ptr.hbm [resolvable:$true] %s847_s6  ;;  %s1060_s9 = int_to_ptr.vmem [resolvable:$true] %s1059_s9 }
 0x1e7   : > { %s1061_s10 = sshrl.u32 %s844_s25, 4  ;;  %s1135_s15 = smov [#allocation3]  }
 0x1e8   : > { %s1066_s14 = scalar_lea.vmem %s1060_s9, %s1061_s10  ;;  %s1070_s16 = scalar_lea.vmem %s1135_s15, 4 }
 0x1e9   : > { %p1067_p13 = scmp.ne.s32.totalorder %s1060_s9, %s1066_s14  ;;  %p1072_p2 = scmp.lt.s32.totalorder %s1070_s16, %s1066_s14 }
 0x1eb   : > { %p1068_p0 = pnand %p1067_p13, %p974_p12 }
 0x1ed   : > { %p1069_p1 = pneg %p1068_p0 }
 0x1ef   : > { %p1074_p3 = pnand %p1072_p2, %p1069_p1 }
 0x1f1   : > { %1077 = shalt.err (!%p1074_p3)
}
 0x1f2   : > { %s1078_s17 = sshra.s32 %s848_s6, 4  ;;  %s1089_s18 = scalar_lea.hbm %s1502_s7, 3  ;;  %s1079_s17 = int_to_ptr.hbm [resolvable:$true] %s1078_s17 }
 0x1f3   : > { %s1085_s20 = scalar_lea.hbm %s1079_s17, %s1061_s10  ;;  %p1090_p8 = scmp.lt.s32.totalorder %s1079_s17, %s1502_s7 }
 0x1f4   : > { %p1086_p4 = scmp.ne.s32.totalorder %s1079_s17, %s1085_s20  ;;  %p1091_p9 = scmp.lt.s32.totalorder %s1089_s18, %s1085_s20 }
 0x1f6   : > { %p1087_p5 = pnand %p1086_p4, %p974_p12  ;;  %p1092_p10 = por %p1091_p9, %p1090_p8 }
 0x1f8   : > { %p1088_p7 = pneg %p1087_p5 }
 0x1fa   : > { %p1093_p11 = pnand %p1092_p10, %p1088_p7 }
 0x1fc   : > { %1096 = shalt.err (!%p1093_p11)
}
 0x1fd   : > { %850 = dma.vmem_to_hbm [thread:$0]  (%p974_p12), %s846_s30, %s844_s25, %s848_s6, %s1440_s19  }
 0x1fe PF: > { %p1014_p13 = scmp.ge.s32.totalorder %s1132_s29, 2  ;;  %s859_s9 = sand.u32 1, %s1120_s26  }
 0x1ff   : > { %s860_s10 = scalar_lea.sflag [#allocation4], %s859_s9 }
 0x200   : > { %p1011_p0 = pnand %p1014_p13, %p1221_p6 }
 0x202   : > { %p1012_p1 = pneg %p1011_p0 }
 0x204   : > { %1115 = dma.done.wait (%p1012_p1), %s860_s10, 32  }
 0x205   : > { %1117 = vsyncadd (%p1012_p1), %s860_s10, 4294967264  ;;  %p19_p2 = scmp.ge.s32.totalorder %s1204_s8, 4   ;;  %s1507_s26 = smov %s1124_s27 }
 0x206   : > { %s1508_s27 = smov %s1128_s28  ;;  %s1509_s28 = smov %s1215_s11 }
 0x207   : > { %s1510_s29 = smov %s1204_s8  ;;  %21 = sbr.rel (!%p19_p2) target bundleno = 6 (0x6), region = 83 }
 0x20c   :  { %866 = vsyncpa [#allocation4], 1 }
 0x20d   :  { %868 = vsyncpa [#allocation4 + $0x1], 1 }

</bundles_post_ra>
